<compile_context>
chip_gen: v5e
topology: v5e:2x2
jax: 0.10.0
libtpu: 0.0.40
codegen_flags: <defaults>
</compile_context>

<pallas_src>
import functools

import jax
import jax.numpy as jnp
import numpy as np
from jax import lax
from jax.experimental import pallas as pl
from jax.experimental.pallas import tpu as pltpu


# ------------------------------ helpers --------------------------------------
def _round_up(x, m):
    return ((x + m - 1) // m) * m


def _pick_tile(total, preferred, multiple):
    """Largest divisor of `total` that is <= preferred and a multiple of
    `multiple`; falls back to `total` (full extent is always legal)."""
    best = None
    hi = min(total, preferred)
    for cand in range(multiple, hi + 1, multiple):
        if total % cand == 0:
            best = cand
    return best if best is not None else total


# ----------------------------- Pallas kernel ---------------------------------
def _make_head_kernel(inv_t):
    """Streamed mean-pool over T + fused 2-layer classifier heads.

    Refs:
      h_ref  : (tile_b, tile_t, E)  current hidden-state tile (layer = -1)
      w1_ref : (E, sum_bottleneck)      b1_ref : (1, sum_bottleneck)
      w2_ref : (sum_bottleneck, pad_ld) b2_ref : (1, pad_ld)   (block-diag, 0-padded)
      out_ref: (tile_b, pad_ld)
      acc_ref: (tile_b, E) f32 scratch accumulator (persists across the T grid)
    """

    def kernel(h_ref, w1_ref, b1_ref, w2_ref, b2_ref, out_ref, acc_ref):
        t = pl.program_id(1)

        @pl.when(t == 0)
        def _init():
            acc_ref[...] = jnp.zeros_like(acc_ref)

        # Streamed sum over this time tile; f32 accumulation regardless of the
        # hidden-state dtype (bf16 inputs are cast per-tile, not whole-array).
        acc_ref[...] += jnp.sum(h_ref[...].astype(jnp.float32), axis=1)

        @pl.when(t == pl.num_programs(1) - 1)
        def _finalize():
            # mean pooling: apply 1/T once on the (tile_b, E) accumulator.
            pooled = acc_ref[...] * inv_t
            # self.dense = nn.Identity() (shared_dense=False)
            # BasicClassifier: Linear -> ReLU -> Dropout(eval: identity) -> Linear
            z = jnp.dot(pooled, w1_ref[...],
                        preferred_element_type=jnp.float32) + b1_ref[...]
            z = jnp.maximum(z, 0.0)                      # activation='relu'
            logits = jnp.dot(z, w2_ref[...],
                             preferred_element_type=jnp.float32) + b2_ref[...]
            out_ref[...] = logits.astype(out_ref.dtype)

    return kernel


def w2v2_classification_head(hidden_state, classifiers, *, tile_b=None, tile_t=128):
    """Fused mean-pool + all classifier heads in a single pallas_call.

    hidden_state : (B, T, E)   selected hidden-state layer
    classifiers  : list of dicts {w1:(E,bn_i), b1:(bn_i,), w2:(bn_i,ld_i), b2:(ld_i,)}
    returns      : (B, sum(ld_i)) f32 logits  (== torch.column_stack(preds))
    """
    B, T, E = hidden_state.shape

    # ---- fuse heads: concat first layer, block-diagonal second layer ----
    w1_cat = jnp.concatenate([c["w1"].astype(jnp.float32) for c in classifiers],
                             axis=1)                                   # (E, sum_bn)
    b1_cat = jnp.concatenate([c["b1"].astype(jnp.float32) for c in classifiers],
                             axis=0)                                   # (sum_bn,)
    bns = [int(c["w1"].shape[1]) for c in classifiers]
    lds = [int(c["w2"].shape[1]) for c in classifiers]
    sum_bn, sum_ld = sum(bns), sum(lds)

    w2_blk = jnp.zeros((sum_bn, sum_ld), jnp.float32)
    r = c0 = 0
    for c, bn, ld in zip(classifiers, bns, lds):
        w2_blk = w2_blk.at[r:r + bn, c0:c0 + ld].set(c["w2"].astype(jnp.float32))
        r += bn
        c0 += ld
    b2_cat = jnp.concatenate([c["b2"].astype(jnp.float32) for c in classifiers],
                             axis=0)                                   # (sum_ld,)

    # ---- lane-dense output: pad the label axis to a multiple of 128 ----
    pad_ld = _round_up(sum_ld, 128)
    w2_pad = jnp.zeros((sum_bn, pad_ld), jnp.float32).at[:, :sum_ld].set(w2_blk)
    b2_pad = jnp.zeros((pad_ld,), jnp.float32).at[:sum_ld].set(b2_cat)

    # ---- tiling ----
    if tile_b is None:
        tile_b = B
    assert B % tile_b == 0 and (tile_b == B or tile_b % 8 == 0)
    tile_t = _pick_tile(T, tile_t, 8)
    assert T % tile_t == 0

    grid = (B // tile_b, T // tile_t)
    kernel = _make_head_kernel(1.0 / float(T))

    out = pl.pallas_call(
        kernel,
        out_shape=jax.ShapeDtypeStruct((B, pad_ld), jnp.float32),
        grid=grid,
        in_specs=[
            # hidden-state stream: tiled over (batch, time); Pallas double-buffers
            # the DMA so tile t+1 copy overlaps tile t's accumulation.
            pl.BlockSpec((tile_b, tile_t, E), lambda b, t: (b, t, 0)),
            # weights/biases: constant index maps -> copied once, VMEM-resident.
            pl.BlockSpec((E, sum_bn), lambda b, t: (0, 0)),
            pl.BlockSpec((1, sum_bn), lambda b, t: (0, 0)),
            pl.BlockSpec((sum_bn, pad_ld), lambda b, t: (0, 0)),
            pl.BlockSpec((1, pad_ld), lambda b, t: (0, 0)),
        ],
        out_specs=pl.BlockSpec((tile_b, pad_ld), lambda b, t: (b, 0)),
        scratch_shapes=[pltpu.VMEM((tile_b, E), jnp.float32)],
        compiler_params=pltpu.CompilerParams(
            dimension_semantics=("parallel", "arbitrary"),
            vmem_limit_bytes=32 * 1024 * 1024,
        ),
    )(hidden_state, w1_cat, b1_cat.reshape(1, -1), w2_pad, b2_pad.reshape(1, -1))

    return out[:, :sum_ld]


# ------------------------- synthetic backbone (glue) -------------------------
def mock_wav2vec2_hidden_states(x, params, stride):
    # TODO(synk): the pretrained HuggingFace Wav2Vec2 backbone (self.model) cannot
    # be reproduced without a checkpoint; it is replaced by a deterministic
    # synthetic backbone (strided conv feature extractor + tanh-linear layers)
    # emitting n_states hidden states of shape (B, T, E), matching the interface
    # the classification head consumes.
    conv_w = params["conv_w"]                                        # (E, 1, K) OIW
    feats = lax.conv_general_dilated(
        x[:, None, :], conv_w, window_strides=(stride,), padding="VALID",
        dimension_numbers=("NCH", "OIH", "NCH"))                     # (B, E, T)
    h = jnp.transpose(feats, (0, 2, 1))                              # (B, T, E)
    hidden_states = [h]
    for wi, bi in zip(params["layer_w"], params["layer_b"]):
        h = jnp.tanh(h @ wi + bi)
        hidden_states.append(h)
    return hidden_states


def w2v2_forward(input_values, params, *, layer=-1, stride=16):
    """Forward pass equivalent of W2V2ForClassification.forward."""
    hidden_states = mock_wav2vec2_hidden_states(input_values, params, stride)
    h = hidden_states[layer]                                         # layer = -1
    # All heads fused into one Pallas kernel (hidden state is streamed once).
    return w2v2_classification_head(h, params["classifiers"])        # (B, sum(label_dims))


# ------------------------------- reference -----------------------------------
def w2v2_forward_ref(input_values, params, *, layer=-1, stride=16):
    hidden_states = mock_wav2vec2_hidden_states(input_values, params, stride)
    h = hidden_states[layer]
    pooled = jnp.mean(h, axis=1)
    preds = []
    for clf in params["classifiers"]:
        z = jnp.maximum(pooled @ clf["w1"] + clf["b1"], 0.0)
        preds.append(z @ clf["w2"] + clf["b2"])
    return jnp.column_stack(preds)


# --------------------------------- main ---------------------------------------
if __name__ == "__main__":
    # Small, module-consistent shapes.
    B, L = 2, 4096           # (batch_size, input_size) waveform
    K, STRIDE = 16, 16       # conv feature extractor -> T = (L-K)/STRIDE + 1 = 256
    E = 32                   # embedding_dim
    N_STATES = 3             # number of hidden states
    BOTTLENECK = 64          # clf_bottleneck (scaled down from 150)
    LABEL_DIMS = [5, 3]      # label_dim given as a list -> two classifier heads

    key = jax.random.PRNGKey(0)
    keys = jax.random.split(key, 4 + 2 * len(LABEL_DIMS))

    classifiers = []
    for i, ld in enumerate(LABEL_DIMS):
        classifiers.append({
            "w1": 0.1 * jax.random.normal(keys[4 + 2 * i], (E, BOTTLENECK), jnp.float32),
            "b1": 0.01 * jnp.ones((BOTTLENECK,), jnp.float32),
            "w2": 0.1 * jax.random.normal(keys[5 + 2 * i], (BOTTLENECK, ld), jnp.float32),
            "b2": 0.01 * jnp.ones((ld,), jnp.float32),
        })

    params = {
        "conv_w": 0.1 * jax.random.normal(keys[0], (E, 1, K), jnp.float32),
        "layer_w": [0.1 * jax.random.normal(keys[1 + i], (E, E), jnp.float32)
                    for i in range(N_STATES - 1)],
        "layer_b": [jnp.zeros((E,), jnp.float32) for _ in range(N_STATES - 1)],
        "classifiers": classifiers,
    }

    input_values = jax.random.normal(keys[3], (B, L), jnp.float32)

    logits = w2v2_forward(input_values, params)
    logits = jax.block_until_ready(logits)

    ref = w2v2_forward_ref(input_values, params)
    assert logits.shape == (B, sum(LABEL_DIMS)), logits.shape
    np.testing.assert_allclose(np.asarray(logits), np.asarray(ref),
                               rtol=1e-5, atol=1e-5)
    print("KERNEL_OK")
</pallas_src>

<mosaic_0001>
module attributes {stable_mosaic.version = 11 : i64} {
  func.func @kernel(%arg0: i32, %arg1: i32, %arg2: memref<2x128x32xf32, #tpu.memory_space<vmem>>, %arg3: memref<32x128xf32, #tpu.memory_space<vmem>>, %arg4: memref<1x128xf32, #tpu.memory_space<vmem>>, %arg5: memref<128x128xf32, #tpu.memory_space<vmem>>, %arg6: memref<1x128xf32, #tpu.memory_space<vmem>>, %arg7: memref<2x128xf32, #tpu.memory_space<vmem>>, %arg8: memref<2x32xf32, #tpu.memory_space<vmem>>) attributes {dimension_semantics = [#tpu.dimension_semantics<parallel>, #tpu.dimension_semantics<arbitrary>], iteration_bounds = array<i64: 1, 2>, scalar_prefetch = 0 : i64, scratch_operands = 1 : i64, tpu.core_type = #tpu.core_type<tc>, window_params = [{transform_indices = @transform_0, window_bounds = array<i64: 2, 128, 32>}, {pipeline_mode = #tpu.pipeline_mode<synchronous>, transform_indices = @transform_1, window_bounds = array<i64: 32, 128>}, {pipeline_mode = #tpu.pipeline_mode<synchronous>, transform_indices = @transform_2, window_bounds = array<i64: 1, 128>}, {pipeline_mode = #tpu.pipeline_mode<synchronous>, transform_indices = @transform_3, window_bounds = array<i64: 128, 128>}, {pipeline_mode = #tpu.pipeline_mode<synchronous>, transform_indices = @transform_4, window_bounds = array<i64: 1, 128>}, {transform_indices = @transform_5, window_bounds = array<i64: 2, 128>}]} {
    %c0_i32 = arith.constant 0 : i32
    %0 = arith.cmpi eq, %arg1, %c0_i32 : i32
    %1 = arith.extui %0 : i1 to i32
    %c0_i32_0 = arith.constant 0 : i32
    %2 = arith.cmpi ne, %1, %c0_i32_0 : i32
    scf.if %2 {
      %cst_8 = arith.constant 0.000000e+00 : f32
      %11 = vector.broadcast %cst_8 : f32 to vector<2x32xf32>
      %c0_9 = arith.constant 0 : index
      %c0_10 = arith.constant 0 : index
      %12 = vector.load %arg8[%c0_9, %c0_10] : memref<2x32xf32, #tpu.memory_space<vmem>>, vector<2x32xf32>
      tpu.vector_store %arg8[%c0_9, %c0_10], %11 {strides = array<i32>} : memref<2x32xf32, #tpu.memory_space<vmem>>, vector<2x32xf32>,
    } else {
    }
    %c0 = arith.constant 0 : index
    %c0_1 = arith.constant 0 : index
    %3 = vector.load %arg8[%c0, %c0_1] : memref<2x32xf32, #tpu.memory_space<vmem>>, vector<2x32xf32>
    %c0_2 = arith.constant 0 : index
    %c0_3 = arith.constant 0 : index
    %c0_4 = arith.constant 0 : index
    %4 = vector.load %arg2[%c0_2, %c0_3, %c0_4] : memref<2x128x32xf32, #tpu.memory_space<vmem>>, vector<2x128x32xf32>
    %cst = arith.constant dense<0.000000e+00> : vector<2x32xf32>
    %5 = vector.multi_reduction <add>, %4, %cst [1] : vector<2x128x32xf32> to vector<2x32xf32>
    %6 = arith.addf %3, %5 : vector<2x32xf32>
    %c0_5 = arith.constant 0 : index
    %c0_6 = arith.constant 0 : index
    %7 = vector.load %arg8[%c0_5, %c0_6] : memref<2x32xf32, #tpu.memory_space<vmem>>, vector<2x32xf32>
    tpu.vector_store %arg8[%c0_5, %c0_6], %6 {strides = array<i32>} : memref<2x32xf32, #tpu.memory_space<vmem>>, vector<2x32xf32>,
    %c1_i32 = arith.constant 1 : i32
    %8 = arith.cmpi eq, %arg1, %c1_i32 : i32
    %9 = arith.extui %8 : i1 to i32
    %c0_i32_7 = arith.constant 0 : i32
    %10 = arith.cmpi ne, %9, %c0_i32_7 : i32
    scf.if %10 {
      %c0_8 = arith.constant 0 : index
      %c0_9 = arith.constant 0 : index
      %11 = vector.load %arg8[%c0_8, %c0_9] : memref<2x32xf32, #tpu.memory_space<vmem>>, vector<2x32xf32>
      %cst_10 = arith.constant 3.906250e-03 : f32
      %12 = vector.broadcast %cst_10 : f32 to vector<2x32xf32>
      %13 = arith.mulf %11, %12 : vector<2x32xf32>
      %c0_11 = arith.constant 0 : index
      %c0_12 = arith.constant 0 : index
      %14 = vector.load %arg3[%c0_11, %c0_12] : memref<32x128xf32, #tpu.memory_space<vmem>>, vector<32x128xf32>
      %cst_13 = arith.constant dense<0.000000e+00> : vector<2x128xf32>
      %15 = tpu.matmul %13, %14, %cst_13 {dimension_numbers = #tpu.dot_dimension_numbers<[1], [0], [0], [1], [0, 0, 1, 1], [], []>} : vector<2x32xf32>, vector<32x128xf32>, vector<2x128xf32> -> vector<2x128xf32>
      %c0_14 = arith.constant 0 : index
      %c0_15 = arith.constant 0 : index
      %16 = vector.load %arg4[%c0_14, %c0_15] : memref<1x128xf32, #tpu.memory_space<vmem>>, vector<1x128xf32>
      %17 = vector.broadcast %16 : vector<1x128xf32> to vector<2x128xf32>
      %18 = arith.addf %15, %17 : vector<2x128xf32>
      %cst_16 = arith.constant 0.000000e+00 : f32
      %19 = vector.broadcast %cst_16 : f32 to vector<2x128xf32>
      %20 = arith.maximumf %18, %19 : vector<2x128xf32>
      %c0_17 = arith.constant 0 : index
      %c0_18 = arith.constant 0 : index
      %21 = vector.load %arg5[%c0_17, %c0_18] : memref<128x128xf32, #tpu.memory_space<vmem>>, vector<128x128xf32>
      %cst_19 = arith.constant dense<0.000000e+00> : vector<2x128xf32>
      %22 = tpu.matmul %20, %21, %cst_19 {dimension_numbers = #tpu.dot_dimension_numbers<[1], [0], [0], [1], [0, 0, 1, 1], [], []>} : vector<2x128xf32>, vector<128x128xf32>, vector<2x128xf32> -> vector<2x128xf32>
      %c0_20 = arith.constant 0 : index
      %c0_21 = arith.constant 0 : index
      %23 = vector.load %arg6[%c0_20, %c0_21] : memref<1x128xf32, #tpu.memory_space<vmem>>, vector<1x128xf32>
      %24 = vector.broadcast %23 : vector<1x128xf32> to vector<2x128xf32>
      %25 = arith.addf %22, %24 : vector<2x128xf32>
      %c0_22 = arith.constant 0 : index
      %c0_23 = arith.constant 0 : index
      %26 = vector.load %arg7[%c0_22, %c0_23] : memref<2x128xf32, #tpu.memory_space<vmem>>, vector<2x128xf32>
      tpu.vector_store %arg7[%c0_22, %c0_23], %25 {strides = array<i32>} : memref<2x128xf32, #tpu.memory_space<vmem>>, vector<2x128xf32>,
    } else {
    }
    return
  }
  func.func @transform_0(%arg0: i32, %arg1: i32) -> (i32, i32, i32) {
    %c0_i32 = arith.constant 0 : i32
    %c0_i32_0 = arith.constant 0 : i32
    return %arg0, %arg1, %c0_i32 : i32, i32, i32
  }
  func.func @transform_1(%arg0: i32, %arg1: i32) -> (i32, i32) {
    %c0_i32 = arith.constant 0 : i32
    %c0_i32_0 = arith.constant 0 : i32
    %c0_i32_1 = arith.constant 0 : i32
    return %c0_i32, %c0_i32_0 : i32, i32
  }
  func.func @transform_2(%arg0: i32, %arg1: i32) -> (i32, i32) {
    %c0_i32 = arith.constant 0 : i32
    %c0_i32_0 = arith.constant 0 : i32
    %c0_i32_1 = arith.constant 0 : i32
    return %c0_i32, %c0_i32_0 : i32, i32
  }
  func.func @transform_3(%arg0: i32, %arg1: i32) -> (i32, i32) {
    %c0_i32 = arith.constant 0 : i32
    %c0_i32_0 = arith.constant 0 : i32
    %c0_i32_1 = arith.constant 0 : i32
    return %c0_i32, %c0_i32_0 : i32, i32
  }
  func.func @transform_4(%arg0: i32, %arg1: i32) -> (i32, i32) {
    %c0_i32 = arith.constant 0 : i32
    %c0_i32_0 = arith.constant 0 : i32
    %c0_i32_1 = arith.constant 0 : i32
    return %c0_i32, %c0_i32_0 : i32, i32
  }
  func.func @transform_5(%arg0: i32, %arg1: i32) -> (i32, i32) {
    %c0_i32 = arith.constant 0 : i32
    %c0_i32_0 = arith.constant 0 : i32
    return %arg0, %c0_i32 : i32, i32
  }
}

</mosaic_0001>

<bundles_post_ra>
// kernel: tpu_custom_call.1
= control target key start
LH: loop header
LB: loop body
LE: loop exit
PB: predicated region body
PF: predicated region fallthrough
CT: control target
= control target key end

     0   :  { %10 = vsyncpa [#allocation5], 0  ;;  %s836_s18 = smov 0   ;;  %s838_s19 = smov 0   ;;  %s1106_s0 = inlined_call_operand.vmem [shape: f32[2,256,32], index: 0, kind: input, shape index: {}]   ;;  %s1107_s1 = inlined_call_operand.vmem [shape: f32[32,128], index: 1, kind: input, shape index: {}]   ;;  %s1108_s2 = inlined_call_operand.vmem [shape: f32[1,128], index: 2, kind: input, shape index: {}]   ;;  %s1109_s3 = inlined_call_operand.vmem [shape: f32[128,128], index: 3, kind: input, shape index: {}]   ;;  %s1110_s4 = inlined_call_operand.vmem [shape: f32[1,128], index: 4, kind: input, shape index: {}]   ;;  %s1111_s5 = inlined_call_operand.hbm [shape: f32[2,128], index: 5, kind: output, shape index: {}]  }
   0x1   :  { %s840_s20 = smov 0   ;;  %s842_s21 = smov 0  }
   0x2   :  { %s844_s22 = smov 0  }
   0x3 LB: > { %s666_s23 = sadd.s32 4294967295, %s802_s22   ;;  %s25_s24 = sadd.s32 1, %s798_s21  ;;  %s802_s22 = sphi %s844_s22, %s16_s22   ;;  %s798_s21 = sphi %s842_s21, %s1115_s21   ;;  %s794_s20 = sphi %s840_s20, %s1114_s20   ;;  %s790_s19 = sphi %s838_s19, %s1113_s19   ;;  %s786_s18 = sphi %s836_s18, %s1112_s18  }
   0x4   : > { %p26_p0 = scmp.ge.s32.totalorder %s25_s24, 2  ;;  %p44_p1 = scmp.ne.s32.totalorder %s790_s19, %s786_s18 }
   0x5   : > { %p45_p2 = scmp.eq.s32.totalorder %s802_s22, 0  ;;  %s37_s26 = sadd.s32 1, %s790_s19 }
   0x6   : > { %s1117_s24 = smov (%p26_p0, %s25_s24), 0  ;;  %p668_p5 = scmp.ge.s32.totalorder %s802_s22, 2 }
   0x7   : > { %p46_p3 = por %p45_p2, %p44_p1  ;;  %s33_s25 = ssub.s32 %s798_s21, %s1117_s24 }
   0x8   : > { %p35_p4 = scmp.eq.s32.totalorder %s33_s25, 0  ;;  %192 = sbr.rel (%p668_p5) target bundleno = 49 (0x31), region = 32 }
   0xa   : > { %s872_s27 = scalar_select %p35_p4, %s790_s19, %s37_s26  }
   0xd   : > { %195 = sbr.rel (!%p46_p3) target bundleno = 49 (0x31), region = 36  ;;  %s197_s28 = sand.u32 (%p46_p3), 1, %s790_s19  }
   0xe   : > { %s681_s29 = sshll.u32 (%p46_p3), %s798_s21, 7  ;;  %s669_s30 = sshll.u32 (%p46_p3), %s197_s28, 8 }
   0xf   : > { %s880_s8 = scalar_lea.vmem (%p46_p3), %s1106_s0, %s681_s29  ;;  %s885_s9 = scalar_lea.vmem (%p46_p3), [#allocation3], %s669_s30 }
  0x10   : > { %v296_v0 = vld [vmem:[%s880_s8] sm:$0xff] (%p46_p3)  ;;  %v298_v1 = vld [vmem:[%s880_s8 + $0x8] sm:$0xff] (%p46_p3)  ;;  %v300_v2 = vld [vmem:[%s880_s8 + $0x10] sm:$0xff] (%p46_p3) }
  0x11   : > { %297 = vst [vmem:[%s885_s9] sm:$0xff] (%p46_p3), %v296_v0  ;;  %v302_v3 = vld [vmem:[%s880_s8 + $0x18] sm:$0xff] (%p46_p3)  ;;  %v304_v4 = vld [vmem:[%s880_s8 + $0x20] sm:$0xff] (%p46_p3)  ;;  %v306_v5 = vld [vmem:[%s880_s8 + $0x28] sm:$0xff] (%p46_p3) }
  0x12   : > { %299 = vst [vmem:[%s885_s9 + $0x8] sm:$0xff] %v298_v1  ;;  %v308_v6 = vld [vmem:[%s880_s8 + $0x30] sm:$0xff]  ;;  %v310_v7 = vld [vmem:[%s880_s8 + $0x38] sm:$0xff]  ;;  %v312_v8 = vld [vmem:[%s880_s8 + $0x40] sm:$0xff] }
  0x13   : > { %301 = vst [vmem:[%s885_s9 + $0x10] sm:$0xff] %v300_v2  ;;  %v314_v9 = vld [vmem:[%s880_s8 + $0x48] sm:$0xff]  ;;  %v316_v10 = vld [vmem:[%s880_s8 + $0x50] sm:$0xff]  ;;  %v318_v11 = vld [vmem:[%s880_s8 + $0x58] sm:$0xff] }
  0x14   : > { %303 = vst [vmem:[%s885_s9 + $0x18] sm:$0xff] %v302_v3  ;;  %v320_v12 = vld [vmem:[%s880_s8 + $0x60] sm:$0xff]  ;;  %v322_v13 = vld [vmem:[%s880_s8 + $0x68] sm:$0xff]  ;;  %v324_v14 = vld [vmem:[%s880_s8 + $0x70] sm:$0xff] }
  0x15   : > { %305 = vst [vmem:[%s885_s9 + $0x20] sm:$0xff] %v304_v4  ;;  %v326_v15 = vld [vmem:[%s880_s8 + $0x78] sm:$0xff]  ;;  %v328_v16 = vld [vmem:[%s880_s8 + $0x100] sm:$0xff]  ;;  %v330_v17 = vld [vmem:[%s880_s8 + $0x108] sm:$0xff] }
  0x16   : > { %307 = vst [vmem:[%s885_s9 + $0x28] sm:$0xff] %v306_v5  ;;  %v332_v18 = vld [vmem:[%s880_s8 + $0x110] sm:$0xff]  ;;  %v334_v19 = vld [vmem:[%s880_s8 + $0x118] sm:$0xff]  ;;  %v336_v20 = vld [vmem:[%s880_s8 + $0x120] sm:$0xff] }
  0x17   : > { %309 = vst [vmem:[%s885_s9 + $0x30] sm:$0xff] %v308_v6  ;;  %v338_v21 = vld [vmem:[%s880_s8 + $0x128] sm:$0xff]  ;;  %v340_v22 = vld [vmem:[%s880_s8 + $0x130] sm:$0xff]  ;;  %v342_v23 = vld [vmem:[%s880_s8 + $0x138] sm:$0xff] }
  0x18   : > { %311 = vst [vmem:[%s885_s9 + $0x38] sm:$0xff] %v310_v7  ;;  %v344_v24 = vld [vmem:[%s880_s8 + $0x140] sm:$0xff]  ;;  %v346_v25 = vld [vmem:[%s880_s8 + $0x148] sm:$0xff]  ;;  %v348_v26 = vld [vmem:[%s880_s8 + $0x150] sm:$0xff] }
  0x19   : > { %313 = vst [vmem:[%s885_s9 + $0x40] sm:$0xff] %v312_v8  ;;  %v350_v27 = vld [vmem:[%s880_s8 + $0x158] sm:$0xff]  ;;  %v352_v28 = vld [vmem:[%s880_s8 + $0x160] sm:$0xff]  ;;  %v354_v29 = vld [vmem:[%s880_s8 + $0x168] sm:$0xff] }
  0x1a   : > { %315 = vst [vmem:[%s885_s9 + $0x48] sm:$0xff] %v314_v9  ;;  %v356_v30 = vld [vmem:[%s880_s8 + $0x170] sm:$0xff]  ;;  %v358_v31 = vld [vmem:[%s880_s8 + $0x178] sm:$0xff] }
  0x1b   : > { %317 = vst [vmem:[%s885_s9 + $0x50] sm:$0xff] %v316_v10 }
  0x1c   : > { %319 = vst [vmem:[%s885_s9 + $0x58] sm:$0xff] %v318_v11 }
  0x1d   : > { %321 = vst [vmem:[%s885_s9 + $0x60] sm:$0xff] %v320_v12 }
  0x1e   : > { %323 = vst [vmem:[%s885_s9 + $0x68] sm:$0xff] %v322_v13 }
  0x1f   : > { %325 = vst [vmem:[%s885_s9 + $0x70] sm:$0xff] %v324_v14 }
  0x20   : > { %327 = vst [vmem:[%s885_s9 + $0x78] sm:$0xff] %v326_v15 }
  0x21   : > { %329 = vst [vmem:[%s885_s9 + $0x80] sm:$0xff] %v328_v16 }
  0x22   : > { %331 = vst [vmem:[%s885_s9 + $0x88] sm:$0xff] %v330_v17 }
  0x23   : > { %333 = vst [vmem:[%s885_s9 + $0x90] sm:$0xff] %v332_v18 }
  0x24   : > { %335 = vst [vmem:[%s885_s9 + $0x98] sm:$0xff] %v334_v19 }
  0x25   : > { %337 = vst [vmem:[%s885_s9 + $0xa0] sm:$0xff] %v336_v20 }
  0x26   : > { %339 = vst [vmem:[%s885_s9 + $0xa8] sm:$0xff] %v338_v21 }
  0x27   : > { %341 = vst [vmem:[%s885_s9 + $0xb0] sm:$0xff] %v340_v22 }
  0x28   : > { %343 = vst [vmem:[%s885_s9 + $0xb8] sm:$0xff] %v342_v23 }
  0x29   : > { %345 = vst [vmem:[%s885_s9 + $0xc0] sm:$0xff] %v344_v24 }
  0x2a   : > { %347 = vst [vmem:[%s885_s9 + $0xc8] sm:$0xff] %v346_v25 }
  0x2b   : > { %349 = vst [vmem:[%s885_s9 + $0xd0] sm:$0xff] %v348_v26 }
  0x2c   : > { %351 = vst [vmem:[%s885_s9 + $0xd8] sm:$0xff] %v350_v27 }
  0x2d   : > { %353 = vst [vmem:[%s885_s9 + $0xe0] sm:$0xff] %v352_v28 }
  0x2e   : > { %355 = vst [vmem:[%s885_s9 + $0xe8] sm:$0xff] %v354_v29 }
  0x2f   : > { %357 = vst [vmem:[%s885_s9 + $0xf0] sm:$0xff] %v356_v30 }
  0x30   : > { %359 = vst [vmem:[%s885_s9 + $0xf8] sm:$0xff] %v358_v31 }
  0x31 PF: > { %p672_p6 = scmp.ge.s32.totalorder %s802_s22, 1  ;;  %p364_p7 = scmp.lt.s32.totalorder %s802_s22, 3 }
  0x33   : > { %p365_p8 = pnand %p672_p6, %p364_p7 }
  0x34   : > { %s371_s10 = sand.u32 (!%p365_p8), 1, %s786_s18   ;;  %p674_p9 = scmp.ne.s32.totalorder (!%p365_p8), %s794_s20, 0 }
  0x35   : > { %368 = sbr.rel (%p365_p8) target bundleno = 389 (0x185), region = 74  ;;  %s673_s11 = sshll.u32 (!%p365_p8), %s371_s10, 8 }
  0x36   : > { %s951_s12 = scalar_lea.vmem (!%p365_p8), [#allocation3], %s673_s11 }
  0x3a   : > { %398 = sbr.rel (%p674_p9) target bundleno = 65 (0x41), region = 82 }
  0x3f   : > { %vm399_vm0 = vcmask 254976   ;;  %v804_v32 = vmov 0.0  }
  0x40   : > { %400 = vst.msk [vmem:[#allocation2] sm:$0x3] %vm399_vm0, %v804_v32 }
  0x41 PF: > { %v402_v33 = vld [vmem:[%s951_s12] sm:$0xff]  ;;  %v403_v34 = vld [vmem:[%s951_s12 + $0x8] sm:$0xff]  ;;  %vm434_vm1 = vcmask 261120   ;;  %v404_v35 = vld [vmem:[%s951_s12 + $0x10] sm:$0xff]  ;;  %vm511_vm2 = vcmask 1041409   ;;  %vm515_vm3 = vcmask 254976  }
  0x42   : > { %v405_v36 = vld [vmem:[%s951_s12 + $0x18] sm:$0xff]  ;;  %v435_v37 = vsel %vm434_vm1, %v402_v33, 0.0  ;;  %v436_v38 = vsel %vm434_vm1, %v403_v34, 0.0  ;;  %v406_v39 = vld [vmem:[%s951_s12 + $0x20] sm:$0xff]  ;;  %v438_v41 = vsel %vm434_vm1, %v404_v35, 0.0  ;;  %v407_v43 = vld [vmem:[%s951_s12 + $0x28] sm:$0xff] }
  0x43   : > { %v437_v40 = vadd.f32 %v436_v38, %v435_v37  ;;  %v440_v42 = vsel %vm434_vm1, %v405_v36, 0.0  ;;  %v408_v45 = vld [vmem:[%s951_s12 + $0x30] sm:$0xff]  ;;  %v418_v46 = vld [vmem:[%s951_s12 + $0x80] sm:$0xff]  ;;  %v442_v47 = vsel %vm434_vm1, %v406_v39, 0.0  ;;  %v419_v48 = vld [vmem:[%s951_s12 + $0x88] sm:$0xff]  ;;  %v444_v53 = vsel %vm434_vm1, %v407_v43, 0.0 }
  0x44   : > { %v420_v49 = vld [vmem:[%s951_s12 + $0x90] sm:$0xff]  ;;  %v421_v50 = vld [vmem:[%s951_s12 + $0x98] sm:$0xff]  ;;  %v472_v52 = vsel %vm434_vm1, %v418_v46, 0.0  ;;  %v473_v54 = vsel %vm434_vm1, %v419_v48, 0.0  ;;  %v422_v57 = vld [vmem:[%s951_s12 + $0xa0] sm:$0xff]  ;;  %v446_v60 = vsel %vm434_vm1, %v408_v45, 0.0 }
  0x45   : > { %v439_v44 = vadd.f32 %v438_v41, %v437_v40  ;;  %v475_v55 = vsel %vm434_vm1, %v420_v49, 0.0  ;;  %v409_v56 = vld [vmem:[%s951_s12 + $0x38] sm:$0xff]  ;;  %v474_v59 = vadd.f32 %v473_v54, %v472_v52  ;;  %v477_v61 = vsel %vm434_vm1, %v421_v50, 0.0  ;;  %v410_v62 = vld [vmem:[%s951_s12 + $0x40] sm:$0xff]  ;;  %v423_v63 = vld [vmem:[%s951_s12 + $0xa8] sm:$0xff]  ;;  %p675_p10 = scmp.ne.s32.totalorder %s794_s20, 1 }
  0x46   : > { %v448_v2 = vsel %vm434_vm1, %v409_v56, 0.0  ;;  %v479_v3 = vsel %vm434_vm1, %v422_v57, 0.0  ;;  %v411_v4 = vld [vmem:[%s951_s12 + $0x48] sm:$0xff]  ;;  %v424_v5 = vld [vmem:[%s951_s12 + $0xb0] sm:$0xff]  ;;  %v450_v8 = vsel %vm434_vm1, %v410_v62, 0.0  ;;  %v481_v9 = vsel %vm434_vm1, %v423_v63, 0.0 }
  0x47   : > { %v441_v51 = vadd.f32 %v440_v42, %v439_v44  ;;  %v476_v1 = vadd.f32 %v475_v55, %v474_v59  ;;  %v412_v10 = vld [vmem:[%s951_s12 + $0x50] sm:$0xff]  ;;  %v425_v11 = vld [vmem:[%s951_s12 + $0xb8] sm:$0xff]  ;;  %v452_v14 = vsel %vm434_vm1, %v411_v4, 0.0  ;;  %v483_v15 = vsel %vm434_vm1, %v424_v5, 0.0  ;;  %v426_v17 = vld [vmem:[%s951_s12 + $0xc0] sm:$0xff] }
  0x48   : > { %v413_v16 = vld [vmem:[%s951_s12 + $0x58] sm:$0xff]  ;;  %v454_v20 = vsel %vm434_vm1, %v412_v10, 0.0  ;;  %v485_v21 = vsel %vm434_vm1, %v425_v11, 0.0  ;;  %v414_v22 = vld [vmem:[%s951_s12 + $0x60] sm:$0xff]  ;;  %v427_v23 = vld [vmem:[%s951_s12 + $0xc8] sm:$0xff]  ;;  %v487_v27 = vsel %vm434_vm1, %v426_v17, 0.0 }
  0x49   : > { %v443_v58 = vadd.f32 %v442_v47, %v441_v51  ;;  %v478_v7 = vadd.f32 %v477_v61, %v476_v1  ;;  %v456_v26 = vsel %vm434_vm1, %v413_v16, 0.0  ;;  %v415_v28 = vld [vmem:[%s951_s12 + $0x68] sm:$0xff]  ;;  %v428_v29 = vld [vmem:[%s951_s12 + $0xd0] sm:$0xff]  ;;  %v458_v32 = vsel %vm434_vm1, %v414_v22, 0.0  ;;  %v429_v35 = vld [vmem:[%s951_s12 + $0xd8] sm:$0xff] }
  0x4a   : > { %v489_v33 = vsel %vm434_vm1, %v427_v23, 0.0  ;;  %v416_v34 = vld [vmem:[%s951_s12 + $0x70] sm:$0xff]  ;;  %v460_v38 = vsel %vm434_vm1, %v415_v28, 0.0  ;;  %v491_v39 = vsel %vm434_vm1, %v428_v29, 0.0  ;;  %v417_v40 = vld [vmem:[%s951_s12 + $0x78] sm:$0xff]  ;;  %v430_v41 = vld [vmem:[%s951_s12 + $0xe0] sm:$0xff] }
  0x4b   : > { %v445_v0 = vadd.f32 %v444_v53, %v443_v58  ;;  %v480_v13 = vadd.f32 %v479_v3, %v478_v7  ;;  %v462_v44 = vsel %vm434_vm1, %v416_v34, 0.0  ;;  %v493_v45 = vsel %vm434_vm1, %v429_v35, 0.0  ;;  %v431_v46 = vld [vmem:[%s951_s12 + $0xe8] sm:$0xff]  ;;  %v432_v51 = vld [vmem:[%s951_s12 + $0xf0] sm:$0xff]  ;;  %v433_v55 = vld [vmem:[%s951_s12 + $0xf8] sm:$0xff] }
  0x4c   : > { %v464_v49 = vsel %vm434_vm1, %v417_v40, 0.0  ;;  %v495_v50 = vsel %vm434_vm1, %v430_v41, 0.0  ;;  %v497_v54 = vsel %vm434_vm1, %v431_v46, 0.0  ;;  %v499_v58 = vsel %vm434_vm1, %v432_v51, 0.0  ;;  %v401_v10 = vld [vmem:[#allocation2] sm:$0x3] }
  0x4d   : > { %v447_v6 = vadd.f32 %v446_v60, %v445_v0  ;;  %v482_v19 = vadd.f32 %v481_v9, %v480_v13  ;;  %v501_v61 = vsel %vm434_vm1, %v433_v55, 0.0 }
  0x4f   : > { %v449_v12 = vadd.f32 %v448_v2, %v447_v6  ;;  %v484_v25 = vadd.f32 %v483_v15, %v482_v19 }
  0x51   : > { %v451_v18 = vadd.f32 %v450_v8, %v449_v12  ;;  %v486_v31 = vadd.f32 %v485_v21, %v484_v25 }
  0x53   : > { %v453_v24 = vadd.f32 %v452_v14, %v451_v18  ;;  %v488_v37 = vadd.f32 %v487_v27, %v486_v31 }
  0x55   : > { %v455_v30 = vadd.f32 %v454_v20, %v453_v24  ;;  %v490_v43 = vadd.f32 %v489_v33, %v488_v37 }
  0x57   : > { %v457_v36 = vadd.f32 %v456_v26, %v455_v30  ;;  %v492_v48 = vadd.f32 %v491_v39, %v490_v43 }
  0x59   : > { %v459_v42 = vadd.f32 %v458_v32, %v457_v36  ;;  %v494_v53 = vadd.f32 %v493_v45, %v492_v48 }
  0x5b   : > { %v461_v47 = vadd.f32 %v460_v38, %v459_v42  ;;  %v496_v57 = vadd.f32 %v495_v50, %v494_v53 }
  0x5d   : > { %v463_v52 = vadd.f32 %v462_v44, %v461_v47  ;;  %v498_v60 = vadd.f32 %v497_v54, %v496_v57 }
  0x5f   : > { %v465_v56 = vadd.f32 %v464_v49, %v463_v52  ;;  %v500_v63 = vadd.f32 %v499_v58, %v498_v60 }
  0x61   : > { %v466_v59 = vrot.slane %v465_v56, 4  ;;  %v502_v1 = vadd.f32 %v501_v61, %v500_v63 }
  0x63   : > { %v467_v62 = vadd.f32 %v466_v59, %v465_v56  ;;  %v503_v3 = vrot.slane %v502_v1, 4 }
  0x65   : > { %v468_v0 = vrot.slane %v467_v62, 2  ;;  %v504_v4 = vadd.f32 %v503_v3, %v502_v1 }
  0x67   : > { %v469_v2 = vadd.f32 %v468_v0, %v467_v62  ;;  %v505_v6 = vrot.slane %v504_v4, 2 }
  0x69   : > { %v470_v5 = vrot.slane %v469_v2, 1  ;;  %v506_v7 = vadd.f32 %v505_v6, %v504_v4 }
  0x6b   : > { %v471_v8 = vadd.f32 %v470_v5, %v469_v2  ;;  %v507_v9 = vrot.slane %v506_v7, 1 }
  0x6d   : > { %v508_v11 = vadd.f32 %v507_v9, %v506_v7 }
  0x6e   : > { %520 = sbr.rel (%p675_p10) target bundleno = 383 (0x17f), region = 86 }
  0x6f   : > { %v512_v12 = vsel %vm511_vm2, %v508_v11, %v471_v8 }
  0x70   : > { %v514_v13 = vadd.f32 %v512_v12, %v401_v10 }
  0x72   : > { %516 = vst.msk [vmem:[#allocation2] sm:$0x3] %vm515_vm3, %v514_v13 }
  0x73   : > { %v526_v14 = vld [vmem:[%s1107_s1 + $0x18] sm:$0xff]  ;;  %v525_v15 = vld [vmem:[%s1107_s1 + $0x10] sm:$0xff]  ;;  %v524_v18 = vld [vmem:[%s1107_s1 + $0x8] sm:$0xff] }
  0x74   : > { %546 = vmatpush.msra.mxu0 %v526_v14  ;;  %v570_v17 = vld [vmem:[%s1109_s3 + $0x78] sm:$0xff]  ;;  %v569_v19 = vld [vmem:[%s1109_s3 + $0x70] sm:$0xff]  ;;  %v568_v20 = vld [vmem:[%s1109_s3 + $0x68] sm:$0xff] }
  0x75   : > { %575 = vmatpush.msra.mxu1 %v570_v17  ;;  %v523_v21 = vld [vmem:[%s1107_s1] sm:$0xff]  ;;  %v566_v24 = vld [vmem:[%s1109_s3 + $0x58] sm:$0xff]  ;;  %v565_v25 = vld [vmem:[%s1109_s3 + $0x50] sm:$0xff] }
  0x76   : > { %547 = vmatpush.msra.mxu0 %v525_v15  ;;  %v567_v23 = vld [vmem:[%s1109_s3 + $0x60] sm:$0xff]  ;;  %v564_v26 = vld [vmem:[%s1109_s3 + $0x48] sm:$0xff]  ;;  %v562_v28 = vld [vmem:[%s1109_s3 + $0x38] sm:$0xff] }
  0x77   : > { %576 = vmatpush.msra.mxu1 %v569_v19  ;;  %v563_v27 = vld [vmem:[%s1109_s3 + $0x40] sm:$0xff]  ;;  %v561_v29 = vld [vmem:[%s1109_s3 + $0x30] sm:$0xff]  ;;  %v560_v30 = vld [vmem:[%s1109_s3 + $0x28] sm:$0xff] }
  0x78   : > { %548 = vmatpush.msra.mxu0 %v524_v18  ;;  %v559_v31 = vld [vmem:[%s1109_s3 + $0x20] sm:$0xff]  ;;  %v558_v32 = vld [vmem:[%s1109_s3 + $0x18] sm:$0xff]  ;;  %v557_v33 = vld [vmem:[%s1109_s3 + $0x10] sm:$0xff] }
  0x79   : > { %v521_v16 = vld [vmem:[#allocation2] sm:$0x3]  ;;  %577 = vmatpush.msra.mxu1 %v568_v20  ;;  %v556_v34 = vld [vmem:[%s1109_s3 + $0x8] sm:$0xff] }
  0x7a   : > { %v522_v22 = vmul.f32 0.00390625, %v521_v16  ;;  %549 = vmatpush.msra.mxu0 %v523_v21  ;;  %v555_v35 = vld [vmem:[%s1109_s3] sm:$0xff] }
  0x7b   : > { %578 = vmatpush.msra.mxu1 %v567_v23  ;;  %v730_v36 = vld [vmem:[%s1108_s2] ss:$0 sm:$0xff] }
  0x7c   : > { %676 = vmatmul.msk.f32.vlgmr.msra.gmra.mxu0 %vm434_vm1, %v522_v22  ;;  %v731_v40 = vld [vmem:[%s1110_s4] ss:$0 sm:$0xff] }
  0x7d   : > { %579 = vmatpush.msra.mxu1 %v566_v24 }
  0x7f   : > { %580 = vmatpush.msra.mxu1 %v565_v25 }
  0x81   : > { %581 = vmatpush.msra.mxu1 %v564_v26 }
  0x83   : > { %582 = vmatpush.msra.mxu1 %v563_v27 }
  0x85   : > { %583 = vmatpush.msra.mxu1 %v562_v28 }
  0x87   : > { %584 = vmatpush.msra.mxu1 %v561_v29 }
  0x89   : > { %585 = vmatpush.msra.mxu1 %v560_v30 }
  0x8b   : > { %586 = vmatpush.msra.mxu1 %v559_v31 }
  0x8d   : > { %587 = vmatpush.msra.mxu1 %v558_v32 }
  0x8f   : > { %588 = vmatpush.msra.mxu1 %v557_v33 }
  0x91   : > { %589 = vmatpush.msra.mxu1 %v556_v34 }
  0x93   : > { %590 = vmatpush.msra.mxu1 %v555_v35 }
  0xf9   : > { %v551_v37 = vpop.f32.mrf.mxu0 }
  0xfa   : > { %v552_v38 = vadd.f32 %v730_v36, %v551_v37 }
  0xfc   : > { %v554_v39 = vmax.f32 %v552_v38, 0.0 }
  0xfe   : > { %591 = vmatmul.f32.vlgmr.msra.gmra.mxu1 %v554_v39 }
 0x17b   : > { %v592_v41 = vpop.f32.mrf.mxu1 }
 0x17c   : > { %v593_v42 = vadd.f32 %v731_v40, %v592_v41 }
 0x17e   : > { %595 = vst [vmem:[#allocation4] sm:$0x3] %v593_v42 }
 0x17f PF: > { %p686_p11 = scmp.eq.s32.totalorder %s666_s23, 1  ;;  %s606_s20 = sshll.u32 %s1111_s5, 4  ;;  %s607_s20 = int_to_ptr.hbm [resolvable:$true] %s606_s20 }
 0x180   : > { %s805_s28 = smov [#allocation4]  }
 0x181   : > { %s604_s29 = sshll.u32 %s805_s28, 4  ;;  %s605_s29 = int_to_ptr.vmem [resolvable:$true] %s604_s29 }
 0x182   : > { %683 = dma.vmem_to_hbm [thread:$0]  (%p686_p11), %s605_s29, 32, %s607_s20, [#allocation5]  }
 0x183   : > { %781 = dma.done.wait (%p686_p11), [#allocation5], 32  }
 0x184   : > { %783 = vsyncadd (%p686_p11), [#allocation5], 4294967264 }
 0x185 PF: > { %s16_s22 = sadd.s32 1, %s802_s22   ;;  %s1112_s18 = smov %s790_s19 }
 0x186   : > { %p13_p12 = scmp.ge.s32.totalorder %s16_s22, 4   ;;  %s1113_s19 = smov %s872_s27 }
 0x187   : > { %s1114_s20 = smov %s798_s21  ;;  %s1115_s21 = smov %s1117_s24 }
 0x188   :  { %15 = sbr.rel (!%p13_p12) target bundleno = 3 (0x3), region = 119 }
 0x18d   :  { %620 = vsyncpa [#allocation5], 1 }
 0x18e   :  { %622 = vsyncpa [#allocation5 + $0x1], 1 }

</bundles_post_ra>
